<compile_context>
chip_gen: v6e
topology: v6e:2x2x1
jax: 0.10.0
libtpu: 0.0.40
codegen_flags: <defaults>
</compile_context>

<pallas_src>
import jax
import jax.numpy as jnp
from jax.experimental import pallas as pl
from jax.experimental.pallas import tpu as pltpu

LANE = 128          # TPU lane width (f32)
SUBLANE = 8         # f32 sublane count
BATCH_TILE_CAP = 256


def _round_up(x, m):
    return (x + m - 1) // m * m


def _vmem_limit_bytes():
    """Per-generation VMEM budget: ~96 MiB on v5e/v6e (128 MiB physical),
    ~48 MiB on v7x (64 MiB physical), with compiler-scratch headroom."""
    try:
        info = pltpu.get_tpu_info()
        cap = int(getattr(info, "vmem_capacity_bytes", 64 << 20))
    except Exception:
        cap = 64 << 20
    return max(32 << 20, min((cap * 3) // 4, 100 << 20))


# ----------------------------------------------------------------------------
# Kernel factory (hw_tile / hw_total / tail-mask flag are static closure args)
# ----------------------------------------------------------------------------
def _make_kernel(hw_tile, hw_total, need_tail_mask):
    def kernel(img_ref, txt_ref, mask_ref, w_branch_ref, b_branch_ref,
               w_head_ref, b_head_ref, out_ref, img_acc_ref):
        hw_idx = pl.program_id(1)

        @pl.when(hw_idx == 0)
        def _init():
            img_acc_ref[...] = jnp.zeros_like(img_acc_ref)

        # Accumulate the spatial sum of this HW chunk; 1/(H*W) is folded into
        # the branch weights so a plain sum suffices.
        chunk = img_ref[...].astype(jnp.float32)                  # (TB, C, hw_tile)
        if need_tail_mask:
            lane = jax.lax.broadcasted_iota(jnp.int32, chunk.shape, 2)
            chunk = jnp.where(hw_idx * hw_tile + lane < hw_total, chunk, 0.0)
        img_acc_ref[...] += jnp.sum(chunk, axis=-1)               # (TB, C)

        @pl.when(hw_idx == pl.num_programs(1) - 1)
        def _finalize():
            pooled_img = img_acc_ref[...]                         # (TB, C)
            # mask_ref already holds mask / clamp(sum(mask), 1) -> plain sum.
            txt = txt_ref[...].astype(jnp.float32)                # (TB, S, D)
            pooled_txt = jnp.sum(txt * mask_ref[...], axis=1)     # (TB, D)

            feat = jnp.concatenate([pooled_img, pooled_txt], axis=-1)  # (TB, C+D)

            # One MXU pass covering both branch projections (block-diag W).
            branch = jnp.dot(feat, w_branch_ref[...],
                             preferred_element_type=jnp.float32) + b_branch_ref[...]
            branch = jnp.maximum(branch, 0.0)                     # (TB, 2H)

            # ADD_CONN + linear_net + out_linear folded into one stacked matmul.
            logits = jnp.dot(branch, w_head_ref[...],
                             preferred_element_type=jnp.float32) + b_head_ref[...]
            out_ref[...] = logits.astype(out_ref.dtype)

    return kernel


# ----------------------------------------------------------------------------
# Wrapper-side algebraic fusion of the parameters (done once per param set).
# ----------------------------------------------------------------------------
def _prepare_fused_params(params, hw):
    w_img = jnp.asarray(params["w_img"], jnp.float32)
    w_txt = jnp.asarray(params["w_txt"], jnp.float32)
    b_img = jnp.asarray(params["b_img"], jnp.float32).reshape(1, -1)
    b_txt = jnp.asarray(params["b_txt"], jnp.float32).reshape(1, -1)
    w_lin = jnp.asarray(params["w_lin"], jnp.float32)
    b_lin = jnp.asarray(params["b_lin"], jnp.float32).reshape(1, -1)
    w_out = jnp.asarray(params["w_out"], jnp.float32)
    b_out = jnp.asarray(params["b_out"], jnp.float32).reshape(1, -1)

    c, hidden = w_img.shape
    d = w_txt.shape[0]
    num_labels = w_out.shape[1]
    assert w_txt.shape[1] == hidden, "text branch hidden dim mismatch"
    assert w_lin.shape == (hidden, hidden), "linear_net shape mismatch"
    assert w_out.shape[0] == hidden, "out_linear shape mismatch"

    # Tight block-diagonal branch weight (K = C + D); image rows prescaled
    # by 1/(H*W) so the kernel pools with a plain sum.
    w_branch = jnp.zeros((c + d, 2 * hidden), jnp.float32)
    w_branch = w_branch.at[:c, :hidden].set(w_img / hw)
    w_branch = w_branch.at[c:, hidden:].set(w_txt)
    b_branch = jnp.concatenate([b_img, b_txt], axis=1)            # (1, 2H)

    # No nonlinearity between linear_net and out_linear -> collapse them.
    # Stack [W_head; W_head] so ADD_CONN of the relu'd halves folds into the
    # head matmul. Output padded to a lane-dense width (unmasked stores).
    w_head = w_lin @ w_out                                         # (H, L)
    b_head = b_lin @ w_out + b_out                                 # (1, L)
    l_pad = _round_up(max(num_labels, LANE), LANE)
    w_head_stacked = jnp.zeros((2 * hidden, l_pad), jnp.float32)
    w_head_stacked = w_head_stacked.at[:hidden, :num_labels].set(w_head)
    w_head_stacked = w_head_stacked.at[hidden:, :num_labels].set(w_head)
    b_head_pad = jnp.zeros((1, l_pad), jnp.float32).at[:, :num_labels].set(b_head)
    return w_branch, b_branch, w_head_stacked, b_head_pad, num_labels, l_pad


def _choose_tiles(b_eff, c, hw, s, d, img_itemsize, txt_itemsize, vmem_limit):
    # --- batch tile: as large as the VMEM budget allows, multiple of 8, <= B.
    txt_row_bytes = s * (d * txt_itemsize + 4)           # txt row + f32 mask row
    input_budget = vmem_limit // 2                       # headroom for weights/out/acc
    max_bt_txt = max(SUBLANE,
                     (input_budget // max(4 * txt_row_bytes, 1)) // SUBLANE * SUBLANE)
    batch_tile = max(SUBLANE,
                     min(BATCH_TILE_CAP, (b_eff // SUBLANE) * SUBLANE, max_bt_txt))
    # Keep >= 2 batch-grid steps when the batch allows it so the "parallel"
    # axis can shard across v7x's two TensorCores (no-op on v5e/v6e).
    if pl.cdiv(b_eff, batch_tile) < 2 and b_eff >= 2 * SUBLANE:
        batch_tile = _round_up(pl.cdiv(b_eff, 2), SUBLANE)

    # --- HW chunk: double-buffered image chunks + resident txt/mask in budget.
    resident_txt = 2 * batch_tile * txt_row_bytes
    img_col_bytes = batch_tile * c * img_itemsize        # bytes per spatial element
    avail = max(input_budget - resident_txt, 2 * img_col_bytes * LANE)
    hw_cap = max(LANE, avail // (2 * img_col_bytes))
    hw_tile = hw if hw <= hw_cap else max(LANE, (hw_cap // LANE) * LANE)
    return batch_tile, hw_tile


def model_forward(img, txt, txt_mask, params):
    """Forward pass of `Model` (ADD_CONN, both branches).

    img: (B, C, H, W) NCHW; txt: (B, S, D); txt_mask: (B, S).
    img/txt are consumed in their stored dtype (f32 or bf16) and cast to f32
    inside the kernel.
    """
    b, c, h, w = img.shape
    s, d = txt.shape[1], txt.shape[2]
    hw = h * w

    img_flat = img.reshape(b, c, hw)                      # free view on NCHW

    # Text-mask prep outside the hot path: exact reciprocal folded into mask.
    mask_f = txt_mask.astype(jnp.float32)
    denom = jnp.maximum(jnp.sum(mask_f, axis=1, keepdims=True), 1.0)
    mask_scaled = (mask_f / denom)[:, :, None]            # (B, S, 1)

    # Pad only the tiny sub-sublane batch case; larger ragged batches use
    # Pallas partial tail blocks instead of rewriting img/txt in HBM.
    b_eff = b
    if b < SUBLANE:
        pad = SUBLANE - b
        img_flat = jnp.pad(img_flat, ((0, pad), (0, 0), (0, 0)))
        txt = jnp.pad(txt, ((0, pad), (0, 0), (0, 0)))
        mask_scaled = jnp.pad(mask_scaled, ((0, pad), (0, 0), (0, 0)))
        b_eff = SUBLANE

    w_branch, b_branch, w_head, b_head, num_labels, l_pad = _prepare_fused_params(params, hw)
    two_hidden = w_branch.shape[1]

    vmem_limit = _vmem_limit_bytes()
    batch_tile, hw_tile = _choose_tiles(
        b_eff, c, hw, s, d,
        jnp.dtype(img.dtype).itemsize, jnp.dtype(txt.dtype).itemsize, vmem_limit)
    grid = (pl.cdiv(b_eff, batch_tile), pl.cdiv(hw, hw_tile))
    need_tail_mask = (hw % hw_tile) != 0

    kernel = _make_kernel(hw_tile, hw, need_tail_mask)

    out_padded = pl.pallas_call(
        kernel,
        out_shape=jax.ShapeDtypeStruct((b_eff, l_pad), jnp.float32),
        grid_spec=pltpu.PrefetchScalarGridSpec(
            num_scalar_prefetch=0,
            grid=grid,
            in_specs=[
                pl.BlockSpec((batch_tile, c, hw_tile), lambda bi, hi: (bi, 0, hi)),
                pl.BlockSpec((batch_tile, s, d), lambda bi, hi: (bi, 0, 0)),
                pl.BlockSpec((batch_tile, s, 1), lambda bi, hi: (bi, 0, 0)),
                pl.BlockSpec((c + d, two_hidden), lambda bi, hi: (0, 0)),
                pl.BlockSpec((1, two_hidden), lambda bi, hi: (0, 0)),
                pl.BlockSpec((two_hidden, l_pad), lambda bi, hi: (0, 0)),
                pl.BlockSpec((1, l_pad), lambda bi, hi: (0, 0)),
            ],
            out_specs=pl.BlockSpec((batch_tile, l_pad), lambda bi, hi: (bi, 0)),
            scratch_shapes=[pltpu.VMEM((batch_tile, c), jnp.float32)],
        ),
        compiler_params=pltpu.CompilerParams(
            dimension_semantics=("parallel", "arbitrary"),
            vmem_limit_bytes=vmem_limit,
        ),
    )(img_flat, txt, mask_scaled, w_branch, b_branch, w_head, b_head)

    # Slice off batch padding / partial-tile rows and the lane padding.
    return out_padded[:b, :num_labels]


# ----------------------------------------------------------------------------
# Deterministic parameter init + pure-JAX (unfused) reference for verification.
# ----------------------------------------------------------------------------
def init_params(key, c, d, hidden, num_labels):
    ks = jax.random.split(key, 8)
    scale = 0.05
    return {
        "w_img": scale * jax.random.normal(ks[0], (c, hidden), jnp.float32),
        "b_img": scale * jax.random.normal(ks[1], (1, hidden), jnp.float32),
        "w_txt": scale * jax.random.normal(ks[2], (d, hidden), jnp.float32),
        "b_txt": scale * jax.random.normal(ks[3], (1, hidden), jnp.float32),
        "w_lin": scale * jax.random.normal(ks[4], (hidden, hidden), jnp.float32),
        "b_lin": scale * jax.random.normal(ks[5], (1, hidden), jnp.float32),
        "w_out": scale * jax.random.normal(ks[6], (hidden, num_labels), jnp.float32),
        "b_out": scale * jax.random.normal(ks[7], (1, num_labels), jnp.float32),
    }


def reference_forward(img, txt, txt_mask, params):
    B, C, H, W = img.shape
    pooled_img = jnp.mean(img.reshape(B, C, H * W), axis=-1)
    img_feat = jnp.maximum(pooled_img @ params["w_img"] + params["b_img"], 0.0)
    mask = txt_mask.astype(jnp.float32)
    denom = jnp.maximum(jnp.sum(mask, axis=1, keepdims=True), 1.0)
    pooled_txt = jnp.sum(txt * mask[:, :, None], axis=1) / denom
    txt_feat = jnp.maximum(pooled_txt @ params["w_txt"] + params["b_txt"], 0.0)
    conn = img_feat + txt_feat                        # ADD_CONN
    hidden = conn @ params["w_lin"] + params["b_lin"]
    return hidden @ params["w_out"] + params["b_out"]


if __name__ == "__main__":
    # Small synthetic shapes consistent with the module's forward.
    B, C, H, W = 2, 4, 16, 16     # image NCHW
    S, D = 8, 32                  # text seq len, embed dim
    hidden_dim, num_labels = 32, 4

    key = jax.random.PRNGKey(0)
    k_img, k_txt, k_param = jax.random.split(key, 3)

    img = jax.random.normal(k_img, (B, C, H, W), jnp.float32)
    txt = jax.random.normal(k_txt, (B, S, D), jnp.float32)
    txt_mask = jnp.array(
        [[1, 1, 1, 1, 1, 0, 0, 0],
         [1, 1, 1, 1, 1, 1, 1, 1]], dtype=jnp.float32)   # (B, S)

    params = init_params(k_param, C, D, hidden_dim, num_labels)

    out = model_forward(img, txt, txt_mask, params)
    out = jax.block_until_ready(out)

    ref = reference_forward(img, txt, txt_mask, params)
    assert out.shape == (B, num_labels)
    # Fused head / folded 1/HW / folded mask-reciprocal change f32 rounding
    # vs the unfused reference -> relaxed tolerance.
    assert jnp.allclose(out, ref, atol=1e-4, rtol=1e-4), "mismatch vs reference"

    print("KERNEL_OK")
</pallas_src>

<mosaic_0001>
module attributes {stable_mosaic.version = 11 : i64} {
  func.func @kernel(%arg0: i32, %arg1: i32, %arg2: memref<8x4x256xf32, #tpu.memory_space<vmem>>, %arg3: memref<8x8x32xf32, #tpu.memory_space<vmem>>, %arg4: memref<8x8x1xf32, #tpu.memory_space<vmem>>, %arg5: memref<36x64xf32, #tpu.memory_space<vmem>>, %arg6: memref<1x64xf32, #tpu.memory_space<vmem>>, %arg7: memref<64x128xf32, #tpu.memory_space<vmem>>, %arg8: memref<1x128xf32, #tpu.memory_space<vmem>>, %arg9: memref<8x128xf32, #tpu.memory_space<vmem>>, %arg10: memref<8x4xf32, #tpu.memory_space<vmem>>) attributes {dimension_semantics = [#tpu.dimension_semantics<parallel>, #tpu.dimension_semantics<arbitrary>], iteration_bounds = array<i64: 1, 1>, scalar_prefetch = 0 : i64, scratch_operands = 1 : i64, tpu.core_type = #tpu.core_type<tc>, window_params = [{transform_indices = @transform_0, window_bounds = array<i64: 8, 4, 256>}, {transform_indices = @transform_1, window_bounds = array<i64: 8, 8, 32>}, {transform_indices = @transform_2, window_bounds = array<i64: 8, 8, 1>}, {pipeline_mode = #tpu.pipeline_mode<synchronous>, transform_indices = @transform_3, window_bounds = array<i64: 36, 64>}, {pipeline_mode = #tpu.pipeline_mode<synchronous>, transform_indices = @transform_4, window_bounds = array<i64: 1, 64>}, {pipeline_mode = #tpu.pipeline_mode<synchronous>, transform_indices = @transform_5, window_bounds = array<i64: 64, 128>}, {pipeline_mode = #tpu.pipeline_mode<synchronous>, transform_indices = @transform_6, window_bounds = array<i64: 1, 128>}, {transform_indices = @transform_7, window_bounds = array<i64: 8, 128>}]} {
    %c0_i32 = arith.constant 0 : i32
    %0 = arith.cmpi eq, %arg1, %c0_i32 : i32
    %1 = arith.extui %0 : i1 to i32
    %c0_i32_0 = arith.constant 0 : i32
    %2 = arith.cmpi ne, %1, %c0_i32_0 : i32
    scf.if %2 {
      %cst_9 = arith.constant 0.000000e+00 : f32
      %11 = vector.broadcast %cst_9 : f32 to vector<8x4xf32>
      %c0_10 = arith.constant 0 : index
      %c0_11 = arith.constant 0 : index
      %12 = vector.load %arg10[%c0_10, %c0_11] : memref<8x4xf32, #tpu.memory_space<vmem>>, vector<8x4xf32>
      tpu.vector_store %arg10[%c0_10, %c0_11], %11 {strides = array<i32>} : memref<8x4xf32, #tpu.memory_space<vmem>>, vector<8x4xf32>,
    } else {
    }
    %c0 = arith.constant 0 : index
    %c0_1 = arith.constant 0 : index
    %c0_2 = arith.constant 0 : index
    %3 = vector.load %arg2[%c0, %c0_1, %c0_2] : memref<8x4x256xf32, #tpu.memory_space<vmem>>, vector<8x4x256xf32>
    %c0_3 = arith.constant 0 : index
    %c0_4 = arith.constant 0 : index
    %4 = vector.load %arg10[%c0_3, %c0_4] : memref<8x4xf32, #tpu.memory_space<vmem>>, vector<8x4xf32>
    %cst = arith.constant dense<0.000000e+00> : vector<8x4xf32>
    %5 = vector.multi_reduction <add>, %3, %cst [2] : vector<8x4x256xf32> to vector<8x4xf32>
    %6 = arith.addf %4, %5 : vector<8x4xf32>
    %c0_5 = arith.constant 0 : index
    %c0_6 = arith.constant 0 : index
    %7 = vector.load %arg10[%c0_5, %c0_6] : memref<8x4xf32, #tpu.memory_space<vmem>>, vector<8x4xf32>
    tpu.vector_store %arg10[%c0_5, %c0_6], %6 {strides = array<i32>} : memref<8x4xf32, #tpu.memory_space<vmem>>, vector<8x4xf32>,
    %c0_i32_7 = arith.constant 0 : i32
    %8 = arith.cmpi eq, %arg1, %c0_i32_7 : i32
    %9 = arith.extui %8 : i1 to i32
    %c0_i32_8 = arith.constant 0 : i32
    %10 = arith.cmpi ne, %9, %c0_i32_8 : i32
    scf.if %10 {
      %c0_9 = arith.constant 0 : index
      %c0_10 = arith.constant 0 : index
      %11 = vector.load %arg10[%c0_9, %c0_10] : memref<8x4xf32, #tpu.memory_space<vmem>>, vector<8x4xf32>
      %c0_11 = arith.constant 0 : index
      %c0_12 = arith.constant 0 : index
      %c0_13 = arith.constant 0 : index
      %12 = vector.load %arg3[%c0_11, %c0_12, %c0_13] : memref<8x8x32xf32, #tpu.memory_space<vmem>>, vector<8x8x32xf32>
      %c0_14 = arith.constant 0 : index
      %c0_15 = arith.constant 0 : index
      %c0_16 = arith.constant 0 : index
      %13 = vector.load %arg4[%c0_14, %c0_15, %c0_16] : memref<8x8x1xf32, #tpu.memory_space<vmem>>, vector<8x8x1xf32>
      %14 = vector.broadcast %13 : vector<8x8x1xf32> to vector<8x8x32xf32>
      %15 = arith.mulf %12, %14 : vector<8x8x32xf32>
      %cst_17 = arith.constant dense<0.000000e+00> : vector<8x32xf32>
      %16 = vector.multi_reduction <add>, %15, %cst_17 [1] : vector<8x8x32xf32> to vector<8x32xf32>
      %17 = tpu.concatenate %11, %16 in 1 : vector<8x4xf32>, vector<8x32xf32> -> vector<8x36xf32>
      %c0_18 = arith.constant 0 : index
      %c0_19 = arith.constant 0 : index
      %18 = vector.load %arg5[%c0_18, %c0_19] : memref<36x64xf32, #tpu.memory_space<vmem>>, vector<36x64xf32>
      %cst_20 = arith.constant dense<0.000000e+00> : vector<8x64xf32>
      %19 = tpu.matmul %17, %18, %cst_20 {dimension_numbers = #tpu.dot_dimension_numbers<[1], [0], [0], [1], [0, 0, 1, 1], [], []>} : vector<8x36xf32>, vector<36x64xf32>, vector<8x64xf32> -> vector<8x64xf32>
      %c0_21 = arith.constant 0 : index
      %c0_22 = arith.constant 0 : index
      %20 = vector.load %arg6[%c0_21, %c0_22] : memref<1x64xf32, #tpu.memory_space<vmem>>, vector<1x64xf32>
      %21 = vector.broadcast %20 : vector<1x64xf32> to vector<8x64xf32>
      %22 = arith.addf %19, %21 : vector<8x64xf32>
      %cst_23 = arith.constant 0.000000e+00 : f32
      %23 = vector.broadcast %cst_23 : f32 to vector<8x64xf32>
      %24 = arith.maximumf %22, %23 : vector<8x64xf32>
      %c0_24 = arith.constant 0 : index
      %c0_25 = arith.constant 0 : index
      %25 = vector.load %arg7[%c0_24, %c0_25] : memref<64x128xf32, #tpu.memory_space<vmem>>, vector<64x128xf32>
      %cst_26 = arith.constant dense<0.000000e+00> : vector<8x128xf32>
      %26 = tpu.matmul %24, %25, %cst_26 {dimension_numbers = #tpu.dot_dimension_numbers<[1], [0], [0], [1], [0, 0, 1, 1], [], []>} : vector<8x64xf32>, vector<64x128xf32>, vector<8x128xf32> -> vector<8x128xf32>
      %c0_27 = arith.constant 0 : index
      %c0_28 = arith.constant 0 : index
      %27 = vector.load %arg8[%c0_27, %c0_28] : memref<1x128xf32, #tpu.memory_space<vmem>>, vector<1x128xf32>
      %28 = vector.broadcast %27 : vector<1x128xf32> to vector<8x128xf32>
      %29 = arith.addf %26, %28 : vector<8x128xf32>
      %c0_29 = arith.constant 0 : index
      %c0_30 = arith.constant 0 : index
      %30 = vector.load %arg9[%c0_29, %c0_30] : memref<8x128xf32, #tpu.memory_space<vmem>>, vector<8x128xf32>
      tpu.vector_store %arg9[%c0_29, %c0_30], %29 {strides = array<i32>} : memref<8x128xf32, #tpu.memory_space<vmem>>, vector<8x128xf32>,
    } else {
    }
    return
  }
  func.func @transform_0(%arg0: i32, %arg1: i32) -> (i32, i32, i32) {
    %c0_i32 = arith.constant 0 : i32
    %c0_i32_0 = arith.constant 0 : i32
    return %arg0, %c0_i32, %arg1 : i32, i32, i32
  }
  func.func @transform_1(%arg0: i32, %arg1: i32) -> (i32, i32, i32) {
    %c0_i32 = arith.constant 0 : i32
    %c0_i32_0 = arith.constant 0 : i32
    %c0_i32_1 = arith.constant 0 : i32
    return %arg0, %c0_i32, %c0_i32_0 : i32, i32, i32
  }
  func.func @transform_2(%arg0: i32, %arg1: i32) -> (i32, i32, i32) {
    %c0_i32 = arith.constant 0 : i32
    %c0_i32_0 = arith.constant 0 : i32
    %c0_i32_1 = arith.constant 0 : i32
    return %arg0, %c0_i32, %c0_i32_0 : i32, i32, i32
  }
  func.func @transform_3(%arg0: i32, %arg1: i32) -> (i32, i32) {
    %c0_i32 = arith.constant 0 : i32
    %c0_i32_0 = arith.constant 0 : i32
    %c0_i32_1 = arith.constant 0 : i32
    return %c0_i32, %c0_i32_0 : i32, i32
  }
  func.func @transform_4(%arg0: i32, %arg1: i32) -> (i32, i32) {
    %c0_i32 = arith.constant 0 : i32
    %c0_i32_0 = arith.constant 0 : i32
    %c0_i32_1 = arith.constant 0 : i32
    return %c0_i32, %c0_i32_0 : i32, i32
  }
  func.func @transform_5(%arg0: i32, %arg1: i32) -> (i32, i32) {
    %c0_i32 = arith.constant 0 : i32
    %c0_i32_0 = arith.constant 0 : i32
    %c0_i32_1 = arith.constant 0 : i32
    return %c0_i32, %c0_i32_0 : i32, i32
  }
  func.func @transform_6(%arg0: i32, %arg1: i32) -> (i32, i32) {
    %c0_i32 = arith.constant 0 : i32
    %c0_i32_0 = arith.constant 0 : i32
    %c0_i32_1 = arith.constant 0 : i32
    return %c0_i32, %c0_i32_0 : i32, i32
  }
  func.func @transform_7(%arg0: i32, %arg1: i32) -> (i32, i32) {
    %c0_i32 = arith.constant 0 : i32
    %c0_i32_0 = arith.constant 0 : i32
    return %arg0, %c0_i32 : i32, i32
  }
}

</mosaic_0001>

<bundles_post_ra>
// kernel: tpu_custom_call.1
= control target key start
LH: loop header
LB: loop body
LE: loop exit
PB: predicated region body
PF: predicated region fallthrough
CT: control target
= control target key end

     0   :  { %12 = vsyncpa [#allocation4], 0  ;;  %s880_s0 = inlined_call_operand.vmem [shape: f32[8,4,256], index: 0, kind: input, shape index: {}]   ;;  %s881_s1 = inlined_call_operand.hbm [shape: f32[8,8,32], index: 1, kind: input, shape index: {}]   ;;  %s882_s2 = inlined_call_operand.vmem [shape: f32[8,8,1], index: 2, kind: input, shape index: {}]   ;;  %s883_s3 = inlined_call_operand.hbm [shape: f32[36,64], index: 3, kind: input, shape index: {}]   ;;  %s884_s4 = inlined_call_operand.vmem [shape: f32[1,64], index: 4, kind: input, shape index: {}]   ;;  %s885_s5 = inlined_call_operand.hbm [shape: f32[64,128], index: 5, kind: input, shape index: {}]   ;;  %s886_s6 = inlined_call_operand.vmem [shape: f32[1,128], index: 6, kind: input, shape index: {}]   ;;  %s887_s7 = inlined_call_operand.hbm [shape: f32[8,128], index: 7, kind: output, shape index: {}]  }
   0x1   :  { %13 = vsyncpa [#allocation7], 0 }
   0x2   :  { %14 = vsyncpa [#allocation5], 0  ;;  %s706_s24 = smov [#allocation6]   ;;  %s707_s26 = smov [#allocation3]  }
   0x3   :  { %s36_s25 = sshll.u32 %s706_s24, 4  ;;  %s22_s27 = sshll.u32 %s707_s26, 4  ;;  %s37_s25 = int_to_ptr.vmem [resolvable:$true] %s36_s25  ;;  %s23_s27 = int_to_ptr.vmem [resolvable:$true] %s22_s27 }
   0x4   :  { %s628_s28 = scalar_lea.vmem %s37_s25, 640  ;;  %p633_p1 = scmp.lt.s32.totalorder %s37_s25, %s37_s25 }
   0x5   :  { %p629_p0 = scmp.ne.s32.totalorder %s37_s25, %s628_s28  ;;  %p634_p2 = scmp.lt.s32.totalorder %s628_s28, %s628_s28 }
   0x7   :  { %p635_p3 = por %p634_p2, %p633_p1 }
   0x9   :  { %p636_p4 = pnand %p635_p3, %p629_p0 }
   0xb   :  { %639 = shalt.err (!%p636_p4)
}
   0xc   :  { %s708_s29 = smov 128   ;;  %s709_s30 = smov 8  }
   0xd   :  { %42 = dma.hbm_to_vmem [thread:$0]  %s883_s3, 640, %s37_s25, [#allocation7], %s708_s29, %s708_s29, %s709_s30  }
   0xe   :  { %s648_s10 = scalar_lea.vmem %s23_s27, 1024  ;;  %p653_p6 = scmp.lt.s32.totalorder %s23_s27, %s23_s27 }
   0xf   :  { %p649_p5 = scmp.ne.s32.totalorder %s23_s27, %s648_s10  ;;  %p654_p7 = scmp.lt.s32.totalorder %s648_s10, %s648_s10 }
  0x11   :  { %p655_p8 = por %p654_p7, %p653_p6 }
  0x13   :  { %p656_p9 = pnand %p655_p8, %p649_p5 }
  0x15   :  { %659 = shalt.err (!%p656_p9)
}
  0x16   :  { %28 = dma.hbm_to_vmem [thread:$0]  %s881_s1, 1024, %s23_s27, [#allocation4], %s708_s29, %s708_s29, %s709_s30  }
  0x17   :  { %s710_s13 = smov [#allocation8]  }
  0x18   :  { %s50_s14 = sshll.u32 %s710_s13, 4  ;;  %s51_s14 = int_to_ptr.vmem [resolvable:$true] %s50_s14 }
  0x19   :  { %s668_s15 = scalar_lea.vmem %s51_s14, 1024  ;;  %p673_p11 = scmp.lt.s32.totalorder %s51_s14, %s51_s14 }
  0x1a   :  { %p669_p10 = scmp.ne.s32.totalorder %s51_s14, %s668_s15  ;;  %p674_p12 = scmp.lt.s32.totalorder %s668_s15, %s668_s15 }
  0x1c   :  { %p675_p13 = por %p674_p12, %p673_p11 }
  0x1e   :  { %p676_p0 = pnand %p675_p13, %p669_p10 }
  0x20   :  { %679 = shalt.err (!%p676_p0)
}
  0x21   :  { %56 = dma.hbm_to_vmem [thread:$0]  %s885_s5, 1024, %s51_s14, [#allocation7], %s708_s29, %s708_s29, %s709_s30  }
  0x22   :  { %700 = dma.done.wait [#allocation4], 1024  }
  0x23   :  { %701 = vsyncadd [#allocation4], 4294966272 }
  0x24   :  { %702 = dma.done.wait [#allocation7], 1664  }
  0x25   :  { %703 = vsyncadd [#allocation7], 4294965632  ;;  %v711_v0 = vmov 0   ;;  %v222_v1 = vld [vmem:[%s882_s2 + $0x10] sm:$0xff]  ;;  %v220_v2 = vld [vmem:[%s882_s2] sm:$0xff]  ;;  %vm107_vm0 = vcmask 1043456  }
  0x26   :  { %611 = vset.pattern.permute.xlu1 %v711_v0  ;;  %610 = vset.pattern.permute.xlu0 %v711_v0  ;;  %v223_v3 = vld [vmem:[%s882_s2 + $0x18] sm:$0xff]  ;;  %v221_v4 = vld [vmem:[%s882_s2 + $0x8] sm:$0xff]  ;;  %v224_v6 = vld [vmem:[%s882_s2 + $0x20] sm:$0xff]  ;;  %vm72_vm1 = vcmask 31744   ;;  %v712_v50 = vmov 0.0   ;;  %vm276_vm2 = vcmask 261120  }
  0x27   :  { %240 = vperm.xlu1 %611, %v222_v1   ;;  %230 = vperm.xlu0 %610, %v220_v2   ;;  %v225_v5 = vld [vmem:[%s882_s2 + $0x28] sm:$0xff]  ;;  %v227_v7 = vld [vmem:[%s882_s2 + $0x38] sm:$0xff]  ;;  %v226_v8 = vld [vmem:[%s882_s2 + $0x30] sm:$0xff]  ;;  %73 = vst.msk [vmem:[#allocation2] sm:$0xff] %vm72_vm1, %v712_v50  ;;  %vm190_vm3 = vcmask 1041409   ;;  %vm192_vm4 = vcmask 1042434  }
  0x28   :  { %v74_v9 = vld [vmem:[%s880_s0] sm:$0xff]  ;;  %v76_v11 = vld [vmem:[%s880_s0 + $0x10] sm:$0xff]  ;;  %v75_v12 = vld [vmem:[%s880_s0 + $0x8] sm:$0xff]  ;;  %568 = vmatprep.subr.mxu0 %v712_v50  ;;  %581 = vmatprep.subr.mxu1 %v712_v50  ;;  %vm194_vm5 = vcmask 1043459   ;;  %vm713_vm6 = vmmov 0   ;;  %vm196_vm7 = vcmask 1044484  }
  0x29   :  { %v91_v10 = vcombine.high %v74_v9, %v74_v9  ;;  %v108_v13 = vsel %vm107_vm0, %v74_v9, 0.0  ;;  %v93_v15 = vcombine.high %v76_v11, %v76_v11  ;;  %v92_v16 = vcombine.high %v75_v12, %v75_v12  ;;  %v77_v17 = vld [vmem:[%s880_s0 + $0x18] sm:$0xff]  ;;  %v78_v18 = vld [vmem:[%s880_s0 + $0x20] sm:$0xff]  ;;  %v79_v26 = vld [vmem:[%s880_s0 + $0x28] sm:$0xff]  ;;  %578 = vmatprep.mubr.msk.f32.mxu0 %vm713_vm6, %v712_v50  ;;  %597 = vmatprep.mubr.msk.f32.mxu1 %vm713_vm6, %v712_v50  ;;  %s715_s24 = smov [#allocation9]  }
  0x2a   :  { %v118_v20 = vsel %vm107_vm0, %v76_v11, 0.0  ;;  %v94_v22 = vcombine.high %v77_v17, %v77_v17  ;;  %v113_v23 = vsel %vm107_vm0, %v75_v12, 0.0  ;;  %v95_v25 = vcombine.high %v78_v18, %v78_v18  ;;  %v80_v27 = vld [vmem:[%s880_s0 + $0x30] sm:$0xff]  ;;  %v81_v36 = vld [vmem:[%s880_s0 + $0x38] sm:$0xff]  ;;  %v356_v49 = vld [vmem:[#allocation6 + $0x20] sm:$0xf] }
  0x2b   :  { %245 = vperm.xlu1 %611, %v223_v3   ;;  %235 = vperm.xlu0 %610, %v221_v4   ;;  %v109_v14 = vsel %vm107_vm0, %v91_v10, 0.0  ;;  %v119_v21 = vsel %vm107_vm0, %v93_v15, 0.0  ;;  %v114_v24 = vsel %vm107_vm0, %v92_v16, 0.0  ;;  %v123_v30 = vsel %vm107_vm0, %v77_v17, 0.0  ;;  %v355_v51 = vld [vmem:[#allocation6 + $0x18] sm:$0xff]  ;;  %v354_v52 = vld [vmem:[#allocation6 + $0x10] sm:$0xff] }
  0x2c   :  { %v110_v19 = vadd.f32 %v109_v14, %v108_v13  ;;  %v120_v28 = vadd.f32 %v119_v21, %v118_v20  ;;  %v115_v29 = vadd.f32 %v114_v24, %v113_v23  ;;  %v124_v31 = vsel %vm107_vm0, %v94_v22, 0.0  ;;  %569 = vmatpush3.msk.msra.mxu0 %vm107_vm0, %v356_v49  ;;  %v353_v53 = vld [vmem:[#allocation6 + $0x8] sm:$0xff]  ;;  %v214_v54 = vld [vmem:[#allocation3 + $0x10] sm:$0xff]  ;;  %v212_v55 = vld [vmem:[#allocation3] sm:$0xff]  ;;  %s714_s0 = smov 4   ;;  %s538_s25 = sshll.u32 %s715_s24, 4  ;;  %s539_s25 = int_to_ptr.vmem [resolvable:$true] %s538_s25 }
  0x2d   :  { %v96_v32 = vcombine.high %v79_v26, %v79_v26  ;;  %v128_v33 = vsel %vm107_vm0, %v78_v18, 0.0  ;;  %v129_v34 = vsel %vm107_vm0, %v95_v25, 0.0  ;;  %v97_v35 = vcombine.high %v80_v27, %v80_v27  ;;  %570 = vmatprep.subr.mxu0 %v712_v50  ;;  %v215_v60 = vld [vmem:[#allocation3 + $0x18] sm:$0xff]  ;;  %v213_v61 = vld [vmem:[#allocation3 + $0x8] sm:$0xff]  ;;  %v216_v9 = vld [vmem:[#allocation3 + $0x20] sm:$0xff]  ;;  %s680_s26 = scalar_lea.vmem %s539_s25, 128  ;;  %p685_p2 = scmp.lt.s32.totalorder %s539_s25, %s539_s25 }
  0x2e   :  { %v125_v37 = vadd.f32 %v124_v31, %v123_v30  ;;  %v130_v38 = vadd.f32 %v129_v34, %v128_v33  ;;  %v133_v39 = vsel %vm107_vm0, %v79_v26, 0.0  ;;  %v98_v41 = vcombine.high %v81_v36, %v81_v36  ;;  %571 = vmatpush3.msra.mxu0 %v355_v51  ;;  %v219_v24 = vld [vmem:[#allocation3 + $0x38] sm:$0xff]  ;;  %v218_v25 = vld [vmem:[#allocation3 + $0x30] sm:$0xff]  ;;  %v352_v51 = vld [vmem:[#allocation6] sm:$0xff]  ;;  %p681_p1 = scmp.ne.s32.totalorder %s539_s25, %s680_s26  ;;  %p686_p3 = scmp.lt.s32.totalorder %s680_s26, %s680_s26 }
  0x2f   :  { %255 = vperm.xlu1 %611, %v225_v5   ;;  %250 = vperm.xlu0 %610, %v224_v6   ;;  %v134_v40 = vsel %vm107_vm0, %v96_v32, 0.0  ;;  %v138_v42 = vsel %vm107_vm0, %v80_v27, 0.0  ;;  %v139_v43 = vsel %vm107_vm0, %v97_v35, 0.0  ;;  %v143_v46 = vsel %vm107_vm0, %v81_v36, 0.0 }
  0x30   :  { %v135_v44 = vadd.f32 %v134_v40, %v133_v39  ;;  %v140_v45 = vadd.f32 %v139_v43, %v138_v42  ;;  %v144_v47 = vsel %vm107_vm0, %v98_v41, 0.0  ;;  %572 = vmatprep.subr.mxu0 %v712_v50  ;;  %vm198_vm8 = vcmask 1045509   ;;  %p687_p4 = por %p686_p3, %p685_p2 }
  0x31   :  { %v145_v48 = vadd.f32 %v144_v47, %v143_v46  ;;  %573 = vmatpush3.msra.mxu0 %v354_v52  ;;  %vm200_vm9 = vcmask 1046534   ;;  %vm202_vm10 = vcmask 1047559   ;;  %vm364_vm11 = vcmask 293888  }
  0x32   :  { %574 = vmatprep.subr.mxu0 %v712_v50  ;;  %vm457_vm12 = vcmask 523264   ;;  %p688_p5 = pnand %p687_p4, %p681_p1 }
  0x33   :  { %265 = vperm.xlu1 %611, %v227_v7   ;;  %260 = vperm.xlu0 %610, %v226_v8   ;;  %v217_v8 = vld [vmem:[#allocation3 + $0x28] sm:$0xff] }
  0x34   :  { %575 = vmatpush3.msra.mxu0 %v353_v53 }
  0x35   :  { %576 = vmatprep.subr.mxu0 %v712_v50 }
  0x36   :  { %577 = vmatpush3.msra.mxu0 %v352_v51 }
  0x52   :  { %111 = vadd.xlane.f32.xlu0 %v110_v19 }
  0x56   :  { %121 = vadd.xlane.f32.xlu0 %v120_v28 }
  0x57   :  { %116 = vadd.xlane.f32.xlu1 %v115_v29 }
  0x5a   :  { %126 = vadd.xlane.f32.xlu0 %v125_v37 }
  0x5b   :  { %131 = vadd.xlane.f32.xlu1 %v130_v38 }
  0x5e   :  { %136 = vadd.xlane.f32.xlu0 %v135_v44 }
  0x5f   :  { %141 = vadd.xlane.f32.xlu1 %v140_v45 }
  0x62   :  { %146 = vadd.xlane.f32.xlu0 %v145_v48 }
  0xa2   :  { %v241_v56 = vpop.permute.xlu1 %240  ;;  %v231_v57 = vpop.permute.xlu0 %230 }
  0xa3   :  { %v270_v58 = vmul.f32 %v241_v56, %v214_v54  ;;  %v268_v59 = vmul.f32 %v231_v57, %v212_v55  ;;  %v449_v56 = vld [vmem:[#allocation8 + $0x38] sm:$0xff]  ;;  %v448_v57 = vld [vmem:[#allocation8 + $0x30] sm:$0xff] }
  0xa4   :  { %582 = vmatpush3.msra.mxu1 %v449_v56  ;;  %v548_v56 = vld [vmem:[%s884_s4] ss:$0 sm:$0xff] }
  0xa5   :  { %v291_v62 = vsel %vm276_vm2, %v270_v58, 0.0  ;;  %v277_v63 = vsel %vm276_vm2, %v268_v59, 0.0  ;;  %583 = vmatprep.subr.mxu1 %v712_v50 }
  0xa6   :  { %v292_v0 = vrot.slane %v291_v62, 4  ;;  %v278_v1 = vrot.slane %v277_v63, 4  ;;  %v246_v2 = vpop.permute.xlu1 %245  ;;  %v236_v3 = vpop.permute.xlu0 %235  ;;  %584 = vmatpush3.msra.mxu1 %v448_v57 }
  0xa7   :  { %v271_v4 = vmul.f32 %v246_v2, %v215_v60  ;;  %v269_v5 = vmul.f32 %v236_v3, %v213_v61  ;;  %585 = vmatprep.subr.mxu1 %v712_v50 }
  0xa8   :  { %v293_v6 = vadd.f32 %v292_v0, %v291_v62  ;;  %v279_v7 = vadd.f32 %v278_v1, %v277_v63  ;;  %v447_v1 = vld [vmem:[#allocation8 + $0x28] sm:$0xff] }
  0xa9   :  { %v298_v10 = vsel %vm276_vm2, %v271_v4, 0.0  ;;  %v284_v11 = vsel %vm276_vm2, %v269_v5, 0.0  ;;  %586 = vmatpush3.msra.mxu1 %v447_v1 }
  0xaa   :  { %v294_v12 = vrot.slane %v293_v6, 2  ;;  %v280_v13 = vrot.slane %v279_v7, 2  ;;  %v299_v14 = vrot.slane %v298_v10, 4  ;;  %v285_v15 = vrot.slane %v284_v11, 4  ;;  %v256_v16 = vpop.permute.xlu1 %255  ;;  %v251_v17 = vpop.permute.xlu0 %250  ;;  %587 = vmatprep.subr.mxu1 %v712_v50 }
  0xab   :  { %v273_v18 = vmul.f32 %v256_v16, %v217_v8  ;;  %v272_v19 = vmul.f32 %v251_v17, %v216_v9  ;;  %v446_v8 = vld [vmem:[#allocation8 + $0x20] sm:$0xff] }
  0xac   :  { %v295_v20 = vadd.f32 %v294_v12, %v293_v6  ;;  %v281_v21 = vadd.f32 %v280_v13, %v279_v7  ;;  %v300_v22 = vadd.f32 %v299_v14, %v298_v10  ;;  %v286_v23 = vadd.f32 %v285_v15, %v284_v11  ;;  %v445_v13 = vld [vmem:[#allocation8 + $0x18] sm:$0xff]  ;;  %588 = vmatpush3.msra.mxu1 %v446_v8 }
  0xad   :  { %v312_v26 = vsel %vm276_vm2, %v273_v18, 0.0  ;;  %v305_v27 = vsel %vm276_vm2, %v272_v19, 0.0  ;;  %589 = vmatprep.subr.mxu1 %v712_v50 }
  0xae   :  { %v301_v28 = vrot.slane %v300_v22, 2  ;;  %v287_v29 = vrot.slane %v286_v23, 2  ;;  %v266_v30 = vpop.permute.xlu1 %265  ;;  %v261_v31 = vpop.permute.xlu0 %260  ;;  %v313_v32 = vrot.slane %v312_v26, 4  ;;  %v306_v33 = vrot.slane %v305_v27, 4  ;;  %590 = vmatpush3.msra.mxu1 %v445_v13 }
  0xaf   :  { %v275_v34 = vmul.f32 %v266_v30, %v219_v24  ;;  %v274_v35 = vmul.f32 %v261_v31, %v218_v25  ;;  %v296_v36 = vrot.slane %v295_v20, 1  ;;  %v282_v37 = vrot.slane %v281_v21, 1  ;;  %591 = vmatprep.subr.mxu1 %v712_v50 }
  0xb0   :  { %v302_v38 = vadd.f32 %v301_v28, %v300_v22  ;;  %v288_v39 = vadd.f32 %v287_v29, %v286_v23  ;;  %v314_v40 = vadd.f32 %v313_v32, %v312_v26  ;;  %v307_v41 = vadd.f32 %v306_v33, %v305_v27 }
  0xb1   :  { %v326_v42 = vsel %vm276_vm2, %v275_v34, 0.0  ;;  %v319_v43 = vsel %vm276_vm2, %v274_v35, 0.0  ;;  %v283_v52 = vadd.f32 %v282_v37, %v281_v21  ;;  %v297_v58 = vadd.f32 %v296_v36, %v295_v20 }
  0xb2   :  { %v303_v44 = vrot.slane %v302_v38, 1  ;;  %v289_v45 = vrot.slane %v288_v39, 1  ;;  %v327_v46 = vrot.slane %v326_v42, 4  ;;  %v320_v47 = vrot.slane %v319_v43, 4 }
  0xb3   :  { %v315_v48 = vrot.slane %v314_v40, 2  ;;  %v308_v49 = vrot.slane %v307_v41, 2  ;;  %v156_v20 = vlaneseq }
  0xb4   :  { %v290_v53 = vadd.f32 %v289_v45, %v288_v39  ;;  %v328_v54 = vadd.f32 %v327_v46, %v326_v42  ;;  %v321_v55 = vadd.f32 %v320_v47, %v319_v43  ;;  %v304_v61 = vadd.f32 %v303_v44, %v302_v38  ;;  %v82_v46 = vld [vmem:[#allocation2] sm:$0xff] }
  0xb5   :  { %v316_v59 = vadd.f32 %v315_v48, %v314_v40  ;;  %v309_v60 = vadd.f32 %v308_v49, %v307_v41  ;;  %v157_v21 = vand.u32 127, %v156_v20  ;;  %v159_v22 = vshrl.u32 %v156_v20, 7 }
  0xb6   :  { %v341_v62 = vsel %vm190_vm3, %v290_v53, %v283_v52  ;;  %v329_v63 = vrot.slane %v328_v54, 2  ;;  %v322_v0 = vrot.slane %v321_v55, 2  ;;  %v444_v53 = vld [vmem:[#allocation8 + $0x10] sm:$0xff] }
  0xb7   :  { %v317_v2 = vrot.slane %v316_v59, 1  ;;  %v310_v3 = vrot.slane %v309_v60, 1  ;;  %v342_v4 = vsel %vm192_vm4, %v297_v58, %v341_v62  ;;  %v160_v23 = vsub.s32 %v157_v21, %v159_v22  ;;  %592 = vmatpush3.msra.mxu1 %v444_v53 }
  0xb8   :  { %v330_v5 = vadd.f32 %v329_v63, %v328_v54  ;;  %v323_v6 = vadd.f32 %v322_v0, %v321_v55  ;;  %v343_v7 = vsel %vm194_vm5, %v304_v61, %v342_v4  ;;  %593 = vmatprep.subr.mxu1 %v712_v50  ;;  %v443_v54 = vld [vmem:[#allocation8 + $0x8] sm:$0xff]  ;;  %v442_v55 = vld [vmem:[#allocation8] sm:$0xff]  ;;  %v551_v61 = vld [vmem:[%s886_s6] ss:$0 sm:$0xff] }
  0xb9   :  { %v318_v9 = vadd.f32 %v317_v2, %v316_v59  ;;  %v311_v10 = vadd.f32 %v310_v3, %v309_v60  ;;  %594 = vmatpush3.msra.mxu1 %v443_v54 }
  0xba   :  { %v331_v11 = vrot.slane %v330_v5, 1  ;;  %v324_v12 = vrot.slane %v323_v6, 1  ;;  %595 = vmatprep.subr.mxu1 %v712_v50 }
  0xbb   :  { %v344_v14 = vsel %vm196_vm7, %v311_v10, %v343_v7  ;;  %596 = vmatpush3.msra.mxu1 %v442_v55 }
  0xbc   :  { %v325_v15 = vadd.f32 %v324_v12, %v323_v6  ;;  %v332_v16 = vadd.f32 %v331_v11, %v330_v5  ;;  %v345_v17 = vsel %vm198_vm8, %v318_v9, %v344_v14 }
  0xbe   :  { %v346_v18 = vsel %vm200_vm9, %v325_v15, %v345_v17 }
  0xbf   :  { %v347_v19 = vsel %vm202_vm10, %v332_v16, %v346_v18 }
  0xc0   :  { %348 = vrot.lane.b32.xlu1 %v347_v19, %s714_s0 }
  0xdb   :  { %v112_v24 = vpop.xlane.xlu0 %111 }
  0xdc   :  { %v161_v25 = vrot.slane %v112_v24, %v160_v23 }
  0xdf   :  { %v122_v26 = vpop.xlane.xlu0 %121 }
  0xe0   :  { %v169_v27 = vrot.slane %v122_v26, %v160_v23  ;;  %v117_v28 = vpop.xlane.xlu1 %116 }
  0xe1   :  { %v165_v29 = vrot.slane %v117_v28, %v160_v23 }
  0xe3   :  { %v191_v30 = vsel %vm190_vm3, %v165_v29, %v161_v25  ;;  %v127_v31 = vpop.xlane.xlu0 %126 }
  0xe4   :  { %v193_v32 = vsel %vm192_vm4, %v169_v27, %v191_v30  ;;  %v173_v33 = vrot.slane %v127_v31, %v160_v23  ;;  %v132_v34 = vpop.xlane.xlu1 %131 }
  0xe5   :  { %v177_v35 = vrot.slane %v132_v34, %v160_v23 }
  0xe6   :  { %v195_v36 = vsel %vm194_vm5, %v173_v33, %v193_v32 }
  0xe7   :  { %v197_v37 = vsel %vm196_vm7, %v177_v35, %v195_v36  ;;  %v137_v38 = vpop.xlane.xlu0 %136 }
  0xe8   :  { %v181_v39 = vrot.slane %v137_v38, %v160_v23  ;;  %v142_v40 = vpop.xlane.xlu1 %141 }
  0xe9   :  { %v185_v41 = vrot.slane %v142_v40, %v160_v23 }
  0xea   :  { %v199_v42 = vsel %vm198_vm8, %v181_v39, %v197_v37 }
  0xeb   :  { %v201_v43 = vsel %vm200_vm9, %v185_v41, %v199_v42  ;;  %v147_v44 = vpop.xlane.xlu0 %146 }
  0xec   :  { %v189_v45 = vrot.slane %v147_v44, %v160_v23 }
  0xee   :  { %v203_v47 = vsel %vm202_vm10, %v189_v45, %v201_v43 }
  0xef   :  { %v205_v48 = vadd.f32 %v203_v47, %v82_v46 }
  0xf1   :  { %207 = vst.msk [vmem:[#allocation2] sm:$0xff] %vm72_vm1, %v205_v48 }
  0xf8   :  { %v211_v51 = vld [vmem:[#allocation2] sm:$0xff] }
 0x132   :  { %v349_v49 = vpop.permute.xlu1 %348 }
 0x133   :  { %v351_v52 = vsel %vm72_vm1, %v211_v51, %v349_v49 }
 0x134   :  { %579 = vmatmul.mubr.msk.f32.vlgmr.msra.gmra.mxu0 %vm364_vm11, %v351_v52 }
 0x1f4   :  { %v437_v57 = vpop.f32.mrf.mxu0 }
 0x1f5   :  { %v438_v58 = vadd.f32 %v548_v56, %v437_v57 }
 0x1f6   :  { %v580_v59 = vpop.f32.mrf.mxu0 }
 0x1f7   :  { %v441_v60 = vmax.f32 %v438_v58, 0.0 }
 0x1f9   :  { %598 = vmatmul.mubr.msk.f32.vlgmr.msra.gmra.mxu1 %vm457_vm12, %v441_v60 }
 0x2b9   :  { %v527_v62 = vpop.f32.mrf.mxu1 }
 0x2ba   :  { %v528_v63 = vadd.f32 %v551_v61, %v527_v62 }
 0x2bb   :  { %v599_v50 = vpop.f32.mrf.mxu1 }
 0x2bc   :  { %531 = vst [vmem:[#allocation9] sm:$0xff] %v528_v63 }
 0x2bd   :  { %691 = shalt.err (!%p688_p5)
}
 0x2be   :  { %541 = dma.vmem_to_hbm [thread:$0]  %s539_s25, 128, %s887_s7, [#allocation5]  }
 0x2bf   :  { %704 = dma.done.wait [#allocation5], 128  }
 0x2c0   :  { %705 = vsyncadd [#allocation5], 4294967168 }
 0x2c1   :  { %545 = vsyncpa [#allocation4], 1 }
 0x2c2   :  { %546 = vsyncpa [#allocation7], 1 }
 0x2c3   :  { %547 = vsyncpa [#allocation5], 1 }

</bundles_post_ra>
